<compile_context>
chip_gen: v7x
topology: tpu7x:2x2x1
jax: 0.10.0
libtpu: 0.0.40
codegen_flags: <defaults>
</compile_context>

<pallas_src>
import functools

import jax
import jax.numpy as jnp
from jax.experimental import pallas as pl
from jax.experimental.pallas import tpu as pltpu

C = 10        # num classes
D = 784       # input features
E = 256       # hidden features

PACKED_W = 128   # single lane-dense output tile width (one vreg of lanes)
PROBS_OFF = 16   # probs live in lanes [PROBS_OFF, PROBS_OFF + C) of the packed output


def _mlp_kernel(x_ref, w1_ref, b1_ref, w2_ref, b2_ref,
                packed_ref, fc1_ref, *, bs, tb):
    # x_ref: (tb, 784) f32     w1_ref: (784, 256) bf16   b1_ref: (1, 256) f32
    # w2_ref: (256, 128) bf16  b2_ref: (1, 128) f32
    # packed_ref: (tb, 128) f32   fc1_ref: (tb, 256) f32

    # In-kernel bf16 cast of the x tile (cheap VPU op; avoids a separate
    # wrapper-side cast pass over x in HBM).
    x = x_ref[...].astype(jnp.bfloat16)

    # fc1 = x @ W1 + b1   (bf16 operands, f32 MXU accumulation)
    fc1 = jnp.dot(x, w1_ref[...], preferred_element_type=jnp.float32) + b1_ref[...]
    fc1_ref[...] = fc1

    # ReLU (VPU, f32), re-cast to bf16 for the second MXU pass.
    h = jnp.maximum(fc1, 0.0).astype(jnp.bfloat16)

    # logits = relu(fc1) @ W2 + b2 ; W2/b2 are zero-padded to 128 classes so
    # lanes >= C are exactly 0.
    logits = jnp.dot(h, w2_ref[...], preferred_element_type=jnp.float32) + b2_ref[...]

    # Softmax over the real C classes only.  Also mask out-of-range tail-block
    # rows (row >= bs) so garbage input rows cannot produce NaN/Inf inside the
    # softmax; those rows are never written back to HBM anyway (masked
    # writeback on the partial tail block) - this is purely defensive.
    col = jax.lax.broadcasted_iota(jnp.int32, logits.shape, 1)
    row = jax.lax.broadcasted_iota(jnp.int32, logits.shape, 0) + pl.program_id(0) * tb
    valid = jnp.logical_and(col < C, row < bs)
    masked = jnp.where(valid, logits, jnp.float32(-1e30))
    m = jnp.max(masked, axis=-1, keepdims=True)
    ex = jnp.exp(masked - m)
    denom = jnp.sum(ex, axis=-1, keepdims=True)
    probs = ex * pl.reciprocal(denom, approx=True)   # rows sum to 1 within ~1e-3

    # Pack logits (lanes 0..C-1) and probs (lanes PROBS_OFF..PROBS_OFF+C-1)
    # into ONE lane-dense (tb, 128) tile: probs are lane-rotated on the XLU
    # (free slot), merged with a single where, and stored with one unmasked
    # full-vreg store -> one output DMA stream instead of two padded ones.
    probs_shift = pltpu.roll(probs, shift=PROBS_OFF, axis=1)
    packed_ref[...] = jnp.where(col < PROBS_OFF, logits, probs_shift)


def prepare_params(w1, b1, w2, b2):
    """One-time weight prep, hoisted out of the per-call forward.

    w1: (784, 256), b1: (256,), w2: (256, 10), b2: (10,)  (in, out) layout,
    i.e. the transpose of PyTorch's nn.Linear weight storage.
    """
    w1_bf = w1.astype(jnp.bfloat16)                                   # (784, 256)
    b1_2d = b1.reshape(1, E).astype(jnp.float32)                      # (1, 256)
    w2_p = jnp.pad(w2.astype(jnp.float32),
                   ((0, 0), (0, PACKED_W - C))).astype(jnp.bfloat16)  # (256, 128)
    b2_p = jnp.pad(b2.reshape(1, C).astype(jnp.float32),
                   ((0, 0), (0, PACKED_W - C)))                       # (1, 128)
    return w1_bf, b1_2d, w2_p, b2_p


def _round_up(n, m):
    return ((n + m - 1) // m) * m


@functools.partial(jax.jit, static_argnames=("tb",))
def net_forward(x, w1_bf, b1_2d, w2_p, b2_p, *, tb=512):
    """Fused MLP Pallas kernel.

    x: (bs, ...) -> flattened to (bs, 784).  Weights from prepare_params().
    Returns (softmax(logits), logits, fc1), mirroring Net.forward with
    prob_only=False.  Outputs are f32.

    tb: batch tile.  v5e/v6e (single TC): biggest tile wins, 512-1024.
    v7x (2 TCs): pick tb so cdiv(bs, tb) >= 2 so both cores get work.
    """
    assert tb % 8 == 0, "tb must be a multiple of 8 (sublane alignment)"
    bs = x.shape[0]
    x2d = x.reshape(bs, -1)                     # view-reshape, no data movement
    assert x2d.shape[1] == D, f"expected flattened dim {D}, got {x2d.shape[1]}"
    x2d = x2d.astype(jnp.float32)               # no-op for f32 inputs

    # Effective tile: never larger than the (sublane-rounded) batch.
    tb_eff = min(tb, _round_up(bs, 8))
    grid = (pl.cdiv(bs, tb_eff),)

    out_shapes = (
        jax.ShapeDtypeStruct((bs, PACKED_W), jnp.float32),  # packed logits|probs
        jax.ShapeDtypeStruct((bs, E), jnp.float32),         # fc1 (pre-relu)
    )

    in_specs = [
        pl.BlockSpec((tb_eff, D), lambda i: (i, 0)),     # x tile (full 784 last dim)
        pl.BlockSpec((D, E), lambda i: (0, 0)),          # W1 (resident)
        pl.BlockSpec((1, E), lambda i: (0, 0)),          # b1
        pl.BlockSpec((E, PACKED_W), lambda i: (0, 0)),   # W2 (zero-padded to 128)
        pl.BlockSpec((1, PACKED_W), lambda i: (0, 0)),   # b2 (zero-padded)
    ]
    out_specs = (
        pl.BlockSpec((tb_eff, PACKED_W), lambda i: (i, 0)),  # packed logits|probs
        pl.BlockSpec((tb_eff, E), lambda i: (i, 0)),         # fc1
    )

    packed, fc1 = pl.pallas_call(
        functools.partial(_mlp_kernel, bs=bs, tb=tb_eff),
        out_shape=out_shapes,
        grid_spec=pltpu.PrefetchScalarGridSpec(
            num_scalar_prefetch=0,
            grid=grid,
            in_specs=in_specs,
            out_specs=out_specs,
        ),
        compiler_params=pltpu.CompilerParams(
            dimension_semantics=("parallel",),
        ),
    )(x2d, w1_bf, b1_2d, w2_p, b2_p)

    # Slice the two real (bs, C) views out of the packed lane-dense output.
    logits = packed[:, :C]
    probs = packed[:, PROBS_OFF:PROBS_OFF + C]
    return probs, logits, fc1


def init_params(key):
    """Deterministic init matching nn.Linear's default U(-1/sqrt(fan_in), ...)."""
    k1, k2, k3, k4 = jax.random.split(key, 4)
    bound1 = 1.0 / jnp.sqrt(D)
    bound2 = 1.0 / jnp.sqrt(E)
    # stored transposed: (in_features, out_features)
    w1 = jax.random.uniform(k1, (D, E), jnp.float32, -bound1, bound1)
    b1 = jax.random.uniform(k2, (E,), jnp.float32, -bound1, bound1)
    w2 = jax.random.uniform(k3, (E, C), jnp.float32, -bound2, bound2)
    b2 = jax.random.uniform(k4, (C,), jnp.float32, -bound2, bound2)
    return w1, b1, w2, b2


if __name__ == "__main__":
    key = jax.random.PRNGKey(0)
    kp, kx = jax.random.split(key)

    w1, b1, w2, b2 = init_params(kp)
    params = prepare_params(w1, b1, w2, b2)   # one-time weight prep

    # Small test: NCHW image batch (bs, 1, 28, 28) -> flattened to (bs, 784).
    # bs=40 with tb=16 gives a 3-step grid with a partial tail block, which
    # exercises the masked-writeback / tail-row-guard path.
    bs = 40
    x = jax.random.normal(kx, (bs, 1, 28, 28), jnp.float32)

    probs, logits, fc1 = net_forward(x, *params, tb=16)
    jax.block_until_ready((probs, logits, fc1))

    # Reference check in plain JAX (f32); tolerances loosened for the bf16
    # matmul operands used inside the kernel and the approx reciprocal.
    x2d = x.reshape(bs, -1)
    fc1_ref = x2d @ w1 + b1
    logits_ref = jnp.maximum(fc1_ref, 0.0) @ w2 + b2
    probs_ref = jax.nn.softmax(logits_ref, axis=-1)

    assert probs.shape == (bs, C) and logits.shape == (bs, C) and fc1.shape == (bs, E)
    assert jnp.allclose(fc1, fc1_ref, atol=3e-2, rtol=3e-2)
    assert jnp.allclose(logits, logits_ref, atol=3e-2, rtol=3e-2)
    assert jnp.allclose(probs, probs_ref, atol=2e-2)
    assert jnp.allclose(jnp.sum(probs, axis=-1), 1.0, atol=5e-3)

    print("KERNEL_OK")
</pallas_src>

<mosaic_0001>
module attributes {stable_mosaic.version = 11 : i64} {
  func.func @_mlp_kernel(%arg0: i32, %arg1: memref<16x784xf32, #tpu.memory_space<vmem>>, %arg2: memref<784x256xbf16, #tpu.memory_space<vmem>>, %arg3: memref<1x256xf32, #tpu.memory_space<vmem>>, %arg4: memref<256x128xbf16, #tpu.memory_space<vmem>>, %arg5: memref<1x128xf32, #tpu.memory_space<vmem>>, %arg6: memref<16x128xf32, #tpu.memory_space<vmem>>, %arg7: memref<16x256xf32, #tpu.memory_space<vmem>>) attributes {dimension_semantics = [#tpu.dimension_semantics<parallel>], iteration_bounds = array<i64: 3>, scalar_prefetch = 0 : i64, scratch_operands = 0 : i64, tpu.core_type = #tpu.core_type<tc>, window_params = [{transform_indices = @transform_0, window_bounds = array<i64: 16, 784>}, {pipeline_mode = #tpu.pipeline_mode<synchronous>, transform_indices = @transform_1, window_bounds = array<i64: 784, 256>}, {pipeline_mode = #tpu.pipeline_mode<synchronous>, transform_indices = @transform_2, window_bounds = array<i64: 1, 256>}, {pipeline_mode = #tpu.pipeline_mode<synchronous>, transform_indices = @transform_3, window_bounds = array<i64: 256, 128>}, {pipeline_mode = #tpu.pipeline_mode<synchronous>, transform_indices = @transform_4, window_bounds = array<i64: 1, 128>}, {transform_indices = @transform_5, window_bounds = array<i64: 16, 128>}, {transform_indices = @transform_6, window_bounds = array<i64: 16, 256>}]} {
    %c0 = arith.constant 0 : index
    %c0_0 = arith.constant 0 : index
    %0 = vector.load %arg1[%c0, %c0_0] : memref<16x784xf32, #tpu.memory_space<vmem>>, vector<16x784xf32>
    %1 = arith.truncf %0 : vector<16x784xf32> to vector<16x784xbf16>
    %c0_1 = arith.constant 0 : index
    %c0_2 = arith.constant 0 : index
    %2 = vector.load %arg2[%c0_1, %c0_2] : memref<784x256xbf16, #tpu.memory_space<vmem>>, vector<784x256xbf16>
    %cst = arith.constant dense<0.000000e+00> : vector<16x256xf32>
    %3 = tpu.matmul %1, %2, %cst {dimension_numbers = #tpu.dot_dimension_numbers<[1], [0], [0], [1], [0, 0, 1, 1], [], []>} : vector<16x784xbf16>, vector<784x256xbf16>, vector<16x256xf32> -> vector<16x256xf32>
    %c0_3 = arith.constant 0 : index
    %c0_4 = arith.constant 0 : index
    %4 = vector.load %arg3[%c0_3, %c0_4] : memref<1x256xf32, #tpu.memory_space<vmem>>, vector<1x256xf32>
    %5 = vector.broadcast %4 : vector<1x256xf32> to vector<16x256xf32>
    %6 = arith.addf %3, %5 : vector<16x256xf32>
    %c0_5 = arith.constant 0 : index
    %c0_6 = arith.constant 0 : index
    %7 = vector.load %arg7[%c0_5, %c0_6] : memref<16x256xf32, #tpu.memory_space<vmem>>, vector<16x256xf32>
    tpu.vector_store %arg7[%c0_5, %c0_6], %6 {strides = array<i32>} : memref<16x256xf32, #tpu.memory_space<vmem>>, vector<16x256xf32>,
    %cst_7 = arith.constant 0.000000e+00 : f32
    %8 = vector.broadcast %cst_7 : f32 to vector<16x256xf32>
    %9 = arith.maximumf %6, %8 : vector<16x256xf32>
    %10 = arith.truncf %9 : vector<16x256xf32> to vector<16x256xbf16>
    %c0_8 = arith.constant 0 : index
    %c0_9 = arith.constant 0 : index
    %11 = vector.load %arg4[%c0_8, %c0_9] : memref<256x128xbf16, #tpu.memory_space<vmem>>, vector<256x128xbf16>
    %cst_10 = arith.constant dense<0.000000e+00> : vector<16x128xf32>
    %12 = tpu.matmul %10, %11, %cst_10 {dimension_numbers = #tpu.dot_dimension_numbers<[1], [0], [0], [1], [0, 0, 1, 1], [], []>} : vector<16x256xbf16>, vector<256x128xbf16>, vector<16x128xf32> -> vector<16x128xf32>
    %c0_11 = arith.constant 0 : index
    %c0_12 = arith.constant 0 : index
    %13 = vector.load %arg5[%c0_11, %c0_12] : memref<1x128xf32, #tpu.memory_space<vmem>>, vector<1x128xf32>
    %14 = vector.broadcast %13 : vector<1x128xf32> to vector<16x128xf32>
    %15 = arith.addf %12, %14 : vector<16x128xf32>
    %16 = tpu.iota {dimensions = array<i32: 1>} : vector<16x128xi32>
    %17 = tpu.iota {dimensions = array<i32: 0>} : vector<16x128xi32>
    %c16_i32 = arith.constant 16 : i32
    %18 = arith.muli %arg0, %c16_i32 : i32
    %19 = vector.broadcast %18 : i32 to vector<16x128xi32>
    %20 = arith.addi %17, %19 : vector<16x128xi32>
    %c10_i32 = arith.constant 10 : i32
    %21 = vector.broadcast %c10_i32 : i32 to vector<16x128xi32>
    %22 = arith.cmpi slt, %16, %21 : vector<16x128xi32>
    %c40_i32 = arith.constant 40 : i32
    %23 = vector.broadcast %c40_i32 : i32 to vector<16x128xi32>
    %24 = arith.cmpi slt, %20, %23 : vector<16x128xi32>
    %25 = arith.andi %22, %24 : vector<16x128xi1>
    %cst_13 = arith.constant -1.000000e+30 : f32
    %26 = vector.broadcast %cst_13 : f32 to vector<16x128xf32>
    %27 = arith.select %25, %15, %26 : vector<16x128xi1>, vector<16x128xf32>
    %cst_14 = arith.constant dense<0xFF800000> : vector<16xf32>
    %28 = vector.multi_reduction <maximumf>, %27, %cst_14 [1] : vector<16x128xf32> to vector<16xf32>
    %29 = vector.shape_cast %28 : vector<16xf32> to vector<16x1xf32>
    %30 = vector.broadcast %29 : vector<16x1xf32> to vector<16x128xf32>
    %31 = arith.subf %27, %30 : vector<16x128xf32>
    %32 = math.exp %31 : vector<16x128xf32>
    %cst_15 = arith.constant dense<0.000000e+00> : vector<16xf32>
    %33 = vector.multi_reduction <add>, %32, %cst_15 [1] : vector<16x128xf32> to vector<16xf32>
    %34 = vector.shape_cast %33 : vector<16xf32> to vector<16x1xf32>
    %35 = tpu.reciprocal %34 {approx = true} : vector<16x1xf32> -> vector<16x1xf32>
    %36 = vector.broadcast %35 : vector<16x1xf32> to vector<16x128xf32>
    %37 = arith.mulf %32, %36 : vector<16x128xf32>
    %c16_i32_16 = arith.constant 16 : i32
    %38 = tpu.dynamic_rotate %37 by %c16_i32_16 dim 1 : vector<16x128xf32>, i32 -> vector<16x128xf32>
    %c16_i32_17 = arith.constant 16 : i32
    %39 = vector.broadcast %c16_i32_17 : i32 to vector<16x128xi32>
    %40 = arith.cmpi slt, %16, %39 : vector<16x128xi32>
    %41 = arith.select %40, %15, %38 : vector<16x128xi1>, vector<16x128xf32>
    %c0_18 = arith.constant 0 : index
    %c0_19 = arith.constant 0 : index
    %42 = vector.load %arg6[%c0_18, %c0_19] : memref<16x128xf32, #tpu.memory_space<vmem>>, vector<16x128xf32>
    tpu.vector_store %arg6[%c0_18, %c0_19], %41 {strides = array<i32>} : memref<16x128xf32, #tpu.memory_space<vmem>>, vector<16x128xf32>,
    return
  }
  func.func @transform_0(%arg0: i32) -> (i32, i32) {
    %c0_i32 = arith.constant 0 : i32
    %c0_i32_0 = arith.constant 0 : i32
    return %arg0, %c0_i32 : i32, i32
  }
  func.func @transform_1(%arg0: i32) -> (i32, i32) {
    %c0_i32 = arith.constant 0 : i32
    %c0_i32_0 = arith.constant 0 : i32
    %c0_i32_1 = arith.constant 0 : i32
    return %c0_i32, %c0_i32_0 : i32, i32
  }
  func.func @transform_2(%arg0: i32) -> (i32, i32) {
    %c0_i32 = arith.constant 0 : i32
    %c0_i32_0 = arith.constant 0 : i32
    %c0_i32_1 = arith.constant 0 : i32
    return %c0_i32, %c0_i32_0 : i32, i32
  }
  func.func @transform_3(%arg0: i32) -> (i32, i32) {
    %c0_i32 = arith.constant 0 : i32
    %c0_i32_0 = arith.constant 0 : i32
    %c0_i32_1 = arith.constant 0 : i32
    return %c0_i32, %c0_i32_0 : i32, i32
  }
  func.func @transform_4(%arg0: i32) -> (i32, i32) {
    %c0_i32 = arith.constant 0 : i32
    %c0_i32_0 = arith.constant 0 : i32
    %c0_i32_1 = arith.constant 0 : i32
    return %c0_i32, %c0_i32_0 : i32, i32
  }
  func.func @transform_5(%arg0: i32) -> (i32, i32) {
    %c0_i32 = arith.constant 0 : i32
    %c0_i32_0 = arith.constant 0 : i32
    return %arg0, %c0_i32 : i32, i32
  }
  func.func @transform_6(%arg0: i32) -> (i32, i32) {
    %c0_i32 = arith.constant 0 : i32
    %c0_i32_0 = arith.constant 0 : i32
    return %arg0, %c0_i32 : i32, i32
  }
}

</mosaic_0001>

<bundles_post_ra>
// kernel: net_forward.1
= control target key start
LH: loop header
LB: loop body
LE: loop exit
PB: predicated region body
PF: predicated region fallthrough
CT: control target
= control target key end

     0   :  { %s2780_s0 = inlined_call_operand.vmem [shape: f32[40,784], index: 0, kind: input, shape index: {}]   ;;  %s2781_s1 = inlined_call_operand.vmem [shape: bf16[784,256], index: 1, kind: input, shape index: {}]   ;;  %s2782_s2 = inlined_call_operand.vmem [shape: f32[1,256], index: 2, kind: input, shape index: {}]   ;;  %s2783_s3 = inlined_call_operand.vmem [shape: bf16[256,128], index: 3, kind: input, shape index: {}]   ;;  %s2784_s4 = inlined_call_operand.vmem [shape: f32[1,128], index: 4, kind: input, shape index: {}]   ;;  %s2785_s5 = inlined_call_operand.vmem [shape: f32[40,128], index: 5, kind: output, shape index: {0}]   ;;  %s2786_s6 = inlined_call_operand.hbm [shape: f32[40,256], index: 6, kind: output, shape index: {1}]  }
   0x1   :  { %2787 = sst [smem:[#allocation6_spill]] %s2780_s0 }
   0x2   :  { %2788 = sst [smem:[#allocation7_spill]] %s2781_s1 }
   0x3   :  { %12 = vsyncpa [#allocation4], 0 }
   0x4   :  { %14 = vsyncpa [#allocation4 + $0x1], 0  ;;  %s2246_s21 = smov 0   ;;  %s2248_s22 = smov 0  }
   0x5   :  { %s2250_s23 = smov 0   ;;  %s2252_s24 = smov 0  }
   0x6 LB: > { %s2267_s25 = sadd.s32 4294967295, %s2172_s24   ;;  %s1605_s26 = sadd.s32 4294967294, %s2172_s24   ;;  %s2172_s24 = sphi %s2252_s24, %s2798_s24   ;;  %s2168_s23 = sphi %s2250_s23, %s2797_s23   ;;  %s2164_s22 = sphi %s2248_s22, %s2796_s22   ;;  %s2160_s21 = sphi %s2246_s21, %s2795_s21  }
   0x7   : > { %s2271_s27 = sadd.s32 1, %s2172_s24   ;;  %s137_s28 = sadd.s32 1, %s2168_s23 }
   0x8   : > { %s134_s29 = ssub.s32 %s2172_s24, %s2271_s27  ;;  %p147_p0 = scmp.ne.s32.totalorder %s2168_s23, %s2164_s22 }
   0x9   : > { %p135_p1 = scmp.eq.s32.totalorder %s134_s29, 0  ;;  %p148_p2 = scmp.eq.s32.totalorder %s2267_s25, 2 }
   0xa   : > { %p179_p3 = scmp.ne.s32.totalorder %s2164_s22, %s2160_s21  ;;  %p180_p4 = scmp.eq.s32.totalorder %s1605_s26, 2 }
   0xb   : > { %s2282_s30 = scalar_select %p135_p1, %s2168_s23, %s137_s28  }
   0xc   : > { %p2284_p5 = por %p148_p2, %p147_p0  ;;  %p2288_p6 = por %p180_p4, %p179_p3 }
   0xd   : > { %p1608_p7 = scmp.ge.s32.totalorder %s2172_s24, 1  ;;  %p230_p8 = scmp.lt.s32.totalorder %s2172_s24, 4 }
   0xf   : > { %p231_p9 = pnand %p1608_p7, %p230_p8 }
  0x10   : > { %s2791_s1 = sld [smem:[#allocation7_spill]] (!%p231_p9)  ;;  %s2313_s26 = sshll.u32 (!%p231_p9), %s2267_s25, 1  ;;  %vm920_vm0 = vcmask (!%p231_p9), 130048  }
  0x11   : > { %234 = sbr.rel (%p231_p9) target bundleno = 1111 (0x457), region = 40  ;;  %p276_p10 = scmp.lt.s32.totalorder (!%p231_p9), %s2313_s26, 4 }
  0x12   : > { %s2792_s0 = sld [smem:[#allocation6_spill]] (!%p231_p9)  ;;  %s2652_s12 = sand.u32 (!%p231_p9), 1, %s2164_s22  }
  0x13   : > { %s1610_s28 = sshll.u32 (!%p231_p9), %s2652_s12, 5  ;;  %s1729_s9 = sshll.u32 (!%p231_p9), %s2267_s25, 4 }
  0x14   : > { %s2667_s29 = scalar_lea.vmem (!%p231_p9), [#allocation3], %s1610_s28  ;;  %s1609_s14 = sshll.u32 (!%p231_p9), %s2652_s12, 4 }
  0x15   : > { %s2682_s15 = scalar_lea.vmem (!%p231_p9), [#allocation2], %s1609_s14  }
  0x16   : > { %v1907_v0 = vld [vmem:[%s2791_s1 + $0x104] ss:$8 sps:$4 sm:$0xff] (!%p231_p9)   ;;  %v1909_v1 = vld [vmem:[%s2791_s1 + $0x100] ss:$8 sps:$4 sm:$0xff] (!%p231_p9)   ;;  %v1910_v2 = vld [vmem:[%s2791_s1 + $0x114] ss:$8 sps:$4 sm:$0xff] (!%p231_p9)  }
  0x17   : > { %967 = vmatprep.subr.bf16.mxu0 (!%p231_p9), %v1907_v0  ;;  %v1912_v3 = vld [vmem:[%s2791_s1 + $0x110] ss:$8 sps:$4 sm:$0xff] (!%p231_p9)   ;;  %v1913_v4 = vld [vmem:[%s2791_s1 + $0x124] ss:$8 sps:$4 sm:$0xff] (!%p231_p9)   ;;  %v1915_v5 = vld [vmem:[%s2791_s1 + $0x120] ss:$8 sps:$4 sm:$0xff] (!%p231_p9)  }
  0x18   : > { %968 = vmatpush1.bf16.msra.mxu0 %v1909_v1  ;;  %v1916_v6 = vld [vmem:[%s2791_s1 + $0x134] ss:$8 sps:$4 sm:$0xff]   ;;  %v1918_v7 = vld [vmem:[%s2791_s1 + $0x130] ss:$8 sps:$4 sm:$0xff]   ;;  %v1919_v8 = vld [vmem:[%s2791_s1 + $0x144] ss:$8 sps:$4 sm:$0xff]   ;;  %s2695_s18 = scalar_lea.vmem (%p2284_p5), %s2785_s5, %s1729_s9  }
  0x19   : > { %969 = vmatprep.subr.bf16.mxu0 %v1910_v2  ;;  %s277_s13 = scalar_select %p276_p10, %s2313_s26, 4  ;;  %v1921_v9 = vld [vmem:[%s2791_s1 + $0x140] ss:$8 sps:$4 sm:$0xff]   ;;  %v1922_v10 = vld [vmem:[%s2791_s1 + $0x154] ss:$8 sps:$4 sm:$0xff]  }
  0x1a   : > { %v1924_v11 = vld [vmem:[%s2791_s1 + $0x150] ss:$8 sps:$4 sm:$0xff]   ;;  %v1949_v12 = vld [vmem:[%s2791_s1 + $0x4] ss:$8 sps:$4 sm:$0xff]   ;;  %v1951_v13 = vld [vmem:[%s2791_s1] ss:$8 sps:$4 sm:$0xff]  }
  0x1b   : > { %s1800_s20 = smul.u32 56, %s277_s13  ;;  %v1925_v14 = vld [vmem:[%s2791_s1 + $0x164] ss:$8 sps:$4 sm:$0xff]   ;;  %924 = vmatprep.subr.bf16.mxu1 %v1949_v12  ;;  %v1955_v15 = vld [vmem:[%s2791_s1 + $0x14] ss:$8 sps:$4 sm:$0xff]   ;;  %s1338_s16 = ssub.s32 (%p2284_p5), 5, %s2313_s26 }
  0x1c   : > { %970 = vmatpush1.bf16.msra.mxu0 %v1912_v3  ;;  %925 = vmatpush1.bf16.msra.mxu1 %v1951_v13  ;;  %v1957_v16 = vld [vmem:[%s2791_s1 + $0x10] ss:$8 sps:$4 sm:$0xff]   ;;  %v1927_v17 = vld [vmem:[%s2791_s1 + $0x160] ss:$8 sps:$4 sm:$0xff]   ;;  %v1928_v18 = vld [vmem:[%s2791_s1 + $0x174] ss:$8 sps:$4 sm:$0xff]  }
  0x1d   : > { %971 = vmatprep.subr.bf16.mxu0 %v1913_v4  ;;  %s2353_s19 = scalar_lea.vmem %s2792_s0, %s1800_s20  ;;  %926 = vmatprep.subr.bf16.mxu1 %v1955_v15  ;;  %v1961_v19 = vld [vmem:[%s2791_s1 + $0x24] ss:$8 sps:$4 sm:$0xff]   ;;  %v1963_v22 = vld [vmem:[%s2791_s1 + $0x20] ss:$8 sps:$4 sm:$0xff]   ;;  %v1930_v24 = vld [vmem:[%s2791_s1 + $0x170] ss:$8 sps:$4 sm:$0xff]  }
  0x1e   : > { %v302_v20 = vld [vmem:[%s2353_s19 + $0x18] sm:$0xff]  ;;  %v309_v21 = vld [vmem:[%s2353_s19 + $0x50] sm:$0xff]  ;;  %v1931_v25 = vld [vmem:[%s2791_s1 + $0x184] ss:$8 sps:$4 sm:$0xff]   ;;  %s2207_s20 = smov 16   ;;  %p1339_p11 = scmp.lt.s32.totalorder (%p2284_p5), %s1338_s16, 2 }
  0x1f   : > { %v316_v23 = vpack.c.bf16 %v309_v21, %v302_v20  ;;  %v1967_v26 = vld [vmem:[%s2791_s1 + $0x34] ss:$8 sps:$4 sm:$0xff]   ;;  %v1969_v27 = vld [vmem:[%s2791_s1 + $0x30] ss:$8 sps:$4 sm:$0xff]   ;;  %v1933_v28 = vld [vmem:[%s2791_s1 + $0x180] ss:$8 sps:$4 sm:$0xff]  }
  0x20   : > { %972 = vmatpush1.bf16.msra.mxu0 %v1915_v5  ;;  %927 = vmatpush1.bf16.msra.mxu1 %v1957_v16  ;;  %v1973_v29 = vld [vmem:[%s2791_s1 + $0x44] ss:$8 sps:$4 sm:$0xff]   ;;  %v1934_v30 = vld [vmem:[%s2791_s1 + $0x194] ss:$8 sps:$4 sm:$0xff]   ;;  %v1975_v31 = vld [vmem:[%s2791_s1 + $0x40] ss:$8 sps:$4 sm:$0xff]  }
  0x21   : > { %973 = vmatprep.subr.bf16.mxu0 %v1916_v6  ;;  %928 = vmatprep.subr.bf16.mxu1 %v1961_v19  ;;  %v1936_v32 = vld [vmem:[%s2791_s1 + $0x190] ss:$8 sps:$4 sm:$0xff]   ;;  %v1979_v33 = vld [vmem:[%s2791_s1 + $0x54] ss:$8 sps:$4 sm:$0xff]   ;;  %v1937_v34 = vld [vmem:[%s2791_s1 + $0x1a4] ss:$8 sps:$4 sm:$0xff]  }
  0x22   : > { %999 = vmatprep.mubr.bf16.mxu0 %v316_v23  ;;  %v1981_v35 = vld [vmem:[%s2791_s1 + $0x50] ss:$8 sps:$4 sm:$0xff]   ;;  %v1939_v36 = vld [vmem:[%s2791_s1 + $0x1a0] ss:$8 sps:$4 sm:$0xff]   ;;  %v1985_v37 = vld [vmem:[%s2791_s1 + $0x64] ss:$8 sps:$4 sm:$0xff]  }
  0x23   : > { %v1940_v38 = vld [vmem:[%s2791_s1 + $0x1b4] ss:$8 sps:$4 sm:$0xff]   ;;  %v1987_v39 = vld [vmem:[%s2791_s1 + $0x60] ss:$8 sps:$4 sm:$0xff]   ;;  %v1942_v40 = vld [vmem:[%s2791_s1 + $0x1b0] ss:$8 sps:$4 sm:$0xff]  }
  0x24   : > { %974 = vmatpush1.bf16.msra.mxu0 %v1918_v7  ;;  %929 = vmatpush1.bf16.msra.mxu1 %v1963_v22  ;;  %v1991_v41 = vld [vmem:[%s2791_s1 + $0x74] ss:$8 sps:$4 sm:$0xff]   ;;  %v1943_v42 = vld [vmem:[%s2791_s1 + $0x1c4] ss:$8 sps:$4 sm:$0xff]   ;;  %v1993_v43 = vld [vmem:[%s2791_s1 + $0x70] ss:$8 sps:$4 sm:$0xff]  }
  0x25   : > { %975 = vmatprep.subr.bf16.mxu0 %v1919_v8  ;;  %930 = vmatprep.subr.bf16.mxu1 %v1967_v26  ;;  %v1945_v44 = vld [vmem:[%s2791_s1 + $0x1c0] ss:$8 sps:$4 sm:$0xff]   ;;  %v1997_v45 = vld [vmem:[%s2791_s1 + $0x84] ss:$8 sps:$4 sm:$0xff]   ;;  %v1946_v46 = vld [vmem:[%s2791_s1 + $0x1d4] ss:$8 sps:$4 sm:$0xff]  }
  0x26   : > { %v1999_v47 = vld [vmem:[%s2791_s1 + $0x80] ss:$8 sps:$4 sm:$0xff]   ;;  %v1948_v48 = vld [vmem:[%s2791_s1 + $0x1d0] ss:$8 sps:$4 sm:$0xff]   ;;  %v2003_v49 = vld [vmem:[%s2791_s1 + $0x94] ss:$8 sps:$4 sm:$0xff]  }
  0x27   : > { %v1952_v50 = vld [vmem:[%s2791_s1 + $0x1e4] ss:$8 sps:$4 sm:$0xff]   ;;  %v2005_v51 = vld [vmem:[%s2791_s1 + $0x90] ss:$8 sps:$4 sm:$0xff]   ;;  %v1954_v52 = vld [vmem:[%s2791_s1 + $0x1e0] ss:$8 sps:$4 sm:$0xff]  }
  0x28   : > { %976 = vmatpush1.bf16.msra.mxu0 %v1921_v9  ;;  %931 = vmatpush1.bf16.msra.mxu1 %v1969_v27  ;;  %v2009_v53 = vld [vmem:[%s2791_s1 + $0xa4] ss:$8 sps:$4 sm:$0xff]   ;;  %v1958_v54 = vld [vmem:[%s2791_s1 + $0x1f4] ss:$8 sps:$4 sm:$0xff]   ;;  %v1960_v55 = vld [vmem:[%s2791_s1 + $0x1f0] ss:$8 sps:$4 sm:$0xff]  }
  0x29   : > { %977 = vmatprep.subr.bf16.mxu0 %v1922_v10  ;;  %932 = vmatprep.subr.bf16.mxu1 %v1973_v29  ;;  %v301_v56 = vld [vmem:[%s2353_s19 + $0x10] sm:$0xff]  ;;  %v2011_v57 = vld [vmem:[%s2791_s1 + $0xa0] ss:$8 sps:$4 sm:$0xff]   ;;  %v1966_v60 = vld [vmem:[%s2791_s1 + $0x204] ss:$8 sps:$4 sm:$0xff]  }
  0x2a   : > { %v308_v58 = vld [vmem:[%s2353_s19 + $0x48] sm:$0xff]  ;;  %v2015_v59 = vld [vmem:[%s2791_s1 + $0xb4] ss:$8 sps:$4 sm:$0xff]   ;;  %v2017_v62 = vld [vmem:[%s2791_s1 + $0xb0] ss:$8 sps:$4 sm:$0xff]  }
  0x2b   : > { %v315_v61 = vpack.c.bf16 %v308_v58, %v301_v56  ;;  %v300_v63 = vld [vmem:[%s2353_s19 + $0x8] sm:$0xff]  ;;  %v307_v2 = vld [vmem:[%s2353_s19 + $0x40] sm:$0xff]  ;;  %v1972_v3 = vld [vmem:[%s2791_s1 + $0x214] ss:$8 sps:$4 sm:$0xff]  }
  0x2c   : > { %978 = vmatpush1.bf16.msra.mxu0 %v1924_v11  ;;  %933 = vmatpush1.bf16.msra.mxu1 %v1975_v31  ;;  %v1964_v0 = vld [vmem:[%s2791_s1 + $0x200] ss:$8 sps:$4 sm:$0xff]   ;;  %v2021_v1 = vld [vmem:[%s2791_s1 + $0xc4] ss:$8 sps:$4 sm:$0xff]   ;;  %v314_v4 = vpack.c.bf16 %v307_v2, %v300_v63  ;;  %v1970_v6 = vld [vmem:[%s2791_s1 + $0x210] ss:$8 sps:$4 sm:$0xff]  }
  0x2d   : > { %979 = vmatprep.subr.bf16.mxu0 %v1925_v14  ;;  %934 = vmatprep.subr.bf16.mxu1 %v1979_v33  ;;  %v2023_v5 = vld [vmem:[%s2791_s1 + $0xc0] ss:$8 sps:$4 sm:$0xff]   ;;  %v2027_v7 = vld [vmem:[%s2791_s1 + $0xd4] ss:$8 sps:$4 sm:$0xff]   ;;  %v1978_v8 = vld [vmem:[%s2791_s1 + $0x224] ss:$8 sps:$4 sm:$0xff]  }
  0x2e   : > { %956 = vmatprep.mubr.bf16.mxu1 %v314_v4  ;;  %v304_v9 = vld [vmem:[%s2353_s19 + $0x28] sm:$0xff]  ;;  %v311_v10 = vld [vmem:[%s2353_s19 + $0x60] sm:$0xff]  ;;  %v2029_v13 = vld [vmem:[%s2791_s1 + $0xd0] ss:$8 sps:$4 sm:$0xff]   ;;  %v2206_v31 = vmov 0  }
  0x2f   : > { %v1976_v11 = vld [vmem:[%s2791_s1 + $0x220] ss:$8 sps:$4 sm:$0xff]   ;;  %v318_v12 = vpack.c.bf16 %v311_v10, %v304_v9  ;;  %v2033_v14 = vld [vmem:[%s2791_s1 + $0xe4] ss:$8 sps:$4 sm:$0xff]   ;;  %v1984_v15 = vld [vmem:[%s2791_s1 + $0x234] ss:$8 sps:$4 sm:$0xff]  }
  0x30   : > { %980 = vmatpush1.bf16.msra.mxu0 %v1927_v17  ;;  %935 = vmatpush1.bf16.msra.mxu1 %v1981_v35  ;;  %v1982_v16 = vld [vmem:[%s2791_s1 + $0x230] ss:$8 sps:$4 sm:$0xff]   ;;  %v1990_v17 = vld [vmem:[%s2791_s1 + $0x244] ss:$8 sps:$4 sm:$0xff]   ;;  %v2039_v19 = vld [vmem:[%s2791_s1 + $0xf4] ss:$8 sps:$4 sm:$0xff]  }
  0x31   : > { %981 = vmatprep.subr.bf16.mxu0 %v1928_v18  ;;  %936 = vmatprep.subr.bf16.mxu1 %v1985_v37  ;;  %v2035_v18 = vld [vmem:[%s2791_s1 + $0xe0] ss:$8 sps:$4 sm:$0xff]   ;;  %v2041_v20 = vld [vmem:[%s2791_s1 + $0xf0] ss:$8 sps:$4 sm:$0xff]   ;;  %v2008_v35 = vld [vmem:[%s2791_s1 + $0x274] ss:$8 sps:$4 sm:$0xff]  }
  0x32   : > { %v299_v21 = vld [vmem:[%s2353_s19] sm:$0xff]  ;;  %v306_v22 = vld [vmem:[%s2353_s19 + $0x38] sm:$0xff]  ;;  %v312_v33 = vld [vmem:[%s2353_s19 + $0x68] sm:$0xff] }
  0x33   : > { %v1988_v23 = vld [vmem:[%s2791_s1 + $0x240] ss:$8 sps:$4 sm:$0xff]   ;;  %v313_v27 = vpack.c.bf16 %v306_v22, %v299_v21  ;;  %v2051_v58 = vld [vmem:[%s2791_s1 + $0x2f0] ss:$8 sps:$4 sm:$0xff]  }
  0x34   : > { %982 = vmatpush1.bf16.msra.mxu0 %v1930_v24  ;;  %937 = vmatpush1.bf16.msra.mxu1 %v1987_v39  ;;  %v2050_v24 = vld [vmem:[%s2791_s1 + $0x304] ss:$8 sps:$4 sm:$0xff]   ;;  %v2048_v26 = vld [vmem:[%s2791_s1 + $0x300] ss:$8 sps:$4 sm:$0xff]   ;;  %v2061_v63 = vld [vmem:[%s2783_s3 + $0x18] sm:$0xff]  }
  0x35   : > { %983 = vmatprep.subr.bf16.mxu0 %v1931_v25  ;;  %938 = vmatprep.subr.bf16.mxu1 %v1991_v41  ;;  %v1996_v25 = vld [vmem:[%s2791_s1 + $0x254] ss:$8 sps:$4 sm:$0xff]   ;;  %v2054_v29 = vld [vmem:[%s2783_s3 + $0x40] sm:$0xff]   ;;  %v2056_v39 = vld [vmem:[%s2783_s3 + $0x48] sm:$0xff]  }
  0x36   : > { %v2055_v37 = vld [vmem:[%s2783_s3] sm:$0xff]   ;;  %v2057_v41 = vld [vmem:[%s2783_s3 + $0x8] sm:$0xff]   ;;  %v2066_v4 = vld [vmem:[%s2783_s3 + $0x70] sm:$0xff]  }
  0x37   : > { %v2045_v56 = vld [vmem:[%s2791_s1 + $0x2e0] ss:$8 sps:$4 sm:$0xff]  }
  0x38   : > { %984 = vmatpush1.bf16.msra.mxu0 %v1933_v28  ;;  %939 = vmatpush1.bf16.msra.mxu1 %v1993_v43  ;;  %v1994_v28 = vld [vmem:[%s2791_s1 + $0x250] ss:$8 sps:$4 sm:$0xff]   ;;  %v2064_v2 = vld [vmem:[%s2783_s3 + $0x68] sm:$0xff]  }
  0x39   : > { %985 = vmatprep.subr.bf16.mxu0 %v1934_v30  ;;  %940 = vmatprep.subr.bf16.mxu1 %v1997_v45  ;;  %v2002_v30 = vld [vmem:[%s2791_s1 + $0x264] ss:$8 sps:$4 sm:$0xff]   ;;  %v2058_v43 = vld [vmem:[%s2783_s3 + $0x50] sm:$0xff]  }
  0x3a   : > { %v2059_v45 = vld [vmem:[%s2783_s3 + $0x10] sm:$0xff]  }
  0x3c   : > { %986 = vmatpush1.bf16.msra.mxu0 %v1936_v32  ;;  %941 = vmatpush1.bf16.msra.mxu1 %v1999_v47  ;;  %v305_v32 = vld [vmem:[%s2353_s19 + $0x30] sm:$0xff]  ;;  %v2026_v47 = vld [vmem:[%s2791_s1 + $0x2a4] ss:$8 sps:$4 sm:$0xff]  }
  0x3d   : > { %987 = vmatprep.subr.bf16.mxu0 %v1937_v34  ;;  %942 = vmatprep.subr.bf16.mxu1 %v2003_v49  ;;  %v2000_v34 = vld [vmem:[%s2791_s1 + $0x260] ss:$8 sps:$4 sm:$0xff]   ;;  %v2032_v49 = vld [vmem:[%s2791_s1 + $0x2b4] ss:$8 sps:$4 sm:$0xff]  }
  0x40   : > { %988 = vmatpush1.bf16.msra.mxu0 %v1939_v36  ;;  %943 = vmatpush1.bf16.msra.mxu1 %v2005_v51  ;;  %v319_v36 = vpack.c.bf16 %v312_v33, %v305_v32  ;;  %v2038_v51 = vld [vmem:[%s2791_s1 + $0x2c4] ss:$8 sps:$4 sm:$0xff]  }
  0x41   : > { %989 = vmatprep.subr.bf16.mxu0 %v1940_v38  ;;  %944 = vmatprep.subr.bf16.mxu1 %v2009_v53  ;;  %v2006_v38 = vld [vmem:[%s2791_s1 + $0x270] ss:$8 sps:$4 sm:$0xff]   ;;  %v2044_v53 = vld [vmem:[%s2791_s1 + $0x2d4] ss:$8 sps:$4 sm:$0xff]  }
  0x44   : > { %990 = vmatpush1.bf16.msra.mxu0 %v1942_v40  ;;  %945 = vmatpush1.bf16.msra.mxu1 %v2011_v57  ;;  %v2014_v40 = vld [vmem:[%s2791_s1 + $0x284] ss:$8 sps:$4 sm:$0xff]   ;;  %v2053_v57 = vld [vmem:[%s2791_s1 + $0x2f4] ss:$8 sps:$4 sm:$0xff]  }
  0x45   : > { %991 = vmatprep.subr.bf16.mxu0 %v1943_v42  ;;  %946 = vmatprep.subr.bf16.mxu1 %v2015_v59  ;;  %v2012_v42 = vld [vmem:[%s2791_s1 + $0x280] ss:$8 sps:$4 sm:$0xff]  }
  0x46   : > { %v303_v59 = vld [vmem:[%s2353_s19 + $0x20] sm:$0xff] }
  0x48   : > { %992 = vmatpush1.bf16.msra.mxu0 %v1945_v44  ;;  %947 = vmatpush1.bf16.msra.mxu1 %v2017_v62  ;;  %v2020_v44 = vld [vmem:[%s2791_s1 + $0x294] ss:$8 sps:$4 sm:$0xff]  }
  0x49   : > { %993 = vmatprep.subr.bf16.mxu0 %v1946_v46  ;;  %948 = vmatprep.subr.bf16.mxu1 %v2021_v1  ;;  %v2018_v46 = vld [vmem:[%s2791_s1 + $0x290] ss:$8 sps:$4 sm:$0xff]   ;;  %v2063_v1 = vld [vmem:[%s2783_s3 + $0x20] sm:$0xff]  }
  0x4a   : > { %v2060_v62 = vld [vmem:[%s2783_s3 + $0x58] sm:$0xff]  }
  0x4c   : > { %994 = vmatpush1.bf16.msra.mxu0 %v1948_v48  ;;  %949 = vmatpush1.bf16.msra.mxu1 %v2023_v5  ;;  %v2024_v48 = vld [vmem:[%s2791_s1 + $0x2a0] ss:$8 sps:$4 sm:$0xff]   ;;  %v2067_v5 = vld [vmem:[%s2783_s3 + $0x30] sm:$0xff]  }
  0x4d   : > { %995 = vmatprep.subr.bf16.mxu0 %v1952_v50  ;;  %950 = vmatprep.subr.bf16.mxu1 %v2027_v7  ;;  %v2030_v50 = vld [vmem:[%s2791_s1 + $0x2b0] ss:$8 sps:$4 sm:$0xff]  }
  0x4e   : > { %v2069_v7 = vld [vmem:[%s2783_s3 + $0x38] sm:$0xff]  }
  0x50   : > { %996 = vmatpush1.bf16.msra.mxu0 %v1954_v52  ;;  %951 = vmatpush1.bf16.msra.mxu1 %v2029_v13  ;;  %v2036_v52 = vld [vmem:[%s2791_s1 + $0x2c0] ss:$8 sps:$4 sm:$0xff]  }
  0x51   : > { %997 = vmatprep.subr.bf16.mxu0 %v1958_v54  ;;  %952 = vmatprep.subr.bf16.mxu1 %v2033_v14  ;;  %v2042_v54 = vld [vmem:[%s2791_s1 + $0x2d0] ss:$8 sps:$4 sm:$0xff]  }
  0x54   : > { %998 = vmatpush1.bf16.msra.mxu0 %v1960_v55  ;;  %953 = vmatpush1.bf16.msra.mxu1 %v2035_v18  ;;  %v2047_v55 = vld [vmem:[%s2791_s1 + $0x2e4] ss:$8 sps:$4 sm:$0xff]  }
  0x55   : > { %1010 = vmatprep.subr.bf16.mxu0 %v1966_v60  ;;  %954 = vmatprep.subr.bf16.mxu1 %v2039_v19  ;;  %v310_v60 = vld [vmem:[%s2353_s19 + $0x58] sm:$0xff]  ;;  %v418_v19 = vld [vmem:[%s2782_s2] sm:$0x3] }
  0x57   : > { %1000 = vmatmul.mubr.bf16.vlgmr.msra.gmra.mrb[0].mxu0 %v315_v61  ;;  %v317_v61 = vpack.c.bf16 %v310_v60, %v303_v59 }
  0x58   : > { %1011 = vmatpush1.bf16.msra.mxu0 %v1964_v0  ;;  %1042 = vmatprep.mubr.bf16.mxu0 %v318_v12  ;;  %v2062_v0 = vld [vmem:[%s2783_s3 + $0x60] sm:$0xff]  }
  0x59   : > { %1012 = vmatprep.subr.bf16.mxu0 %v1972_v3  ;;  %955 = vmatpush1.bf16.msra.mxu1 %v2041_v20  ;;  %v2065_v3 = vld [vmem:[%s2783_s3 + $0x28] sm:$0xff]  }
  0x5a   : > { %1053 = vmatprep.subr.bf16.mxu1 %v2050_v24 }
  0x5c   : > { %1013 = vmatpush1.bf16.msra.mxu0 %v1970_v6  ;;  %957 = vmatmul.mubr.bf16.vlgmr.msra.gmra.mrb[0].mxu1 %v313_v27  ;;  %v2068_v6 = vld [vmem:[%s2783_s3 + $0x78] sm:$0xff]  }
  0x5d   : > { %1014 = vmatprep.subr.bf16.mxu0 %v1978_v8  ;;  %1054 = vmatpush1.bf16.msra.mxu1 %v2048_v26 }
  0x5e   : > { %1085 = vmatprep.mubr.bf16.mxu1 %v2206_v31  ;;  %1762 = vmatprep.subr.bf16.mxu1 %v2054_v29 }
  0x60   : > { %1015 = vmatpush1.bf16.msra.mxu0 %v1976_v11 }
  0x61   : > { %1016 = vmatprep.subr.bf16.mxu0 %v1984_v15 }
  0x64   : > { %1017 = vmatpush1.bf16.msra.mxu0 %v1982_v16  ;;  %1711 = vmatmul.mubr.msk.bf16.vlgmr.msra.gmra.mrb[4].mxu1 %vm920_vm0, %v319_v36  ;;  %v420_v16 = vlaneseq }
  0x65   : > { %1018 = vmatprep.subr.bf16.mxu0 %v1990_v17  ;;  %1763 = vmatpush3.bf16.msra.mxu1 %v2055_v37 }
  0x66   : > { %1764 = vmatprep.subr.bf16.mxu1 %v2056_v39  ;;  %v421_v17 = vshrl.u32 %v420_v16, 7 }
  0x68   : > { %1019 = vmatpush1.bf16.msra.mxu0 %v1988_v23  ;;  %v422_v18 = vsub.s32 0, %v421_v17  ;;  %v426_v20 = vsub.s32 1, %v421_v17 }
  0x69   : > { %1020 = vmatprep.subr.bf16.mxu0 %v1996_v25  ;;  %1765 = vmatpush3.bf16.msra.mxu1 %v2057_v41 }
  0x6a   : > { %1766 = vmatprep.subr.bf16.mxu1 %v2058_v43  ;;  %v423_v21 = vrot.slane %v418_v19, %v422_v18  ;;  %v427_v22 = vrot.slane %v418_v19, %v426_v20 }
  0x6c   : > { %1021 = vmatpush1.bf16.msra.mxu0 %v1994_v28 }
  0x6d   : > { %1022 = vmatprep.subr.bf16.mxu0 %v2002_v30  ;;  %1767 = vmatpush3.bf16.msra.mxu1 %v2059_v45  ;;  %v1288_v45 = vstv %s1729_s9 }
  0x6e   : > { %1768 = vmatprep.subr.bf16.mxu1 %v2060_v62 }
  0x70   : > { %1023 = vmatpush1.bf16.msra.mxu0 %v2000_v34 }
  0x71   : > { %1024 = vmatprep.subr.bf16.mxu0 %v2008_v35  ;;  %1769 = vmatpush3.bf16.msra.mxu1 %v2061_v63 }
  0x72   : > { %1770 = vmatprep.subr.bf16.mxu1 %v2062_v0 }
  0x74   : > { %1025 = vmatpush1.bf16.msra.mxu0 %v2006_v38 }
  0x75   : > { %1026 = vmatprep.subr.bf16.mxu0 %v2014_v40  ;;  %1771 = vmatpush3.bf16.msra.mxu1 %v2063_v1 }
  0x76   : > { %1772 = vmatprep.subr.bf16.mxu1 %v2064_v2 }
  0x78   : > { %1027 = vmatpush1.bf16.msra.mxu0 %v2012_v42 }
  0x79   : > { %1028 = vmatprep.subr.bf16.mxu0 %v2020_v44  ;;  %1773 = vmatpush3.bf16.msra.mxu1 %v2065_v3 }
  0x7a   : > { %1774 = vmatprep.subr.bf16.mxu1 %v2066_v4 }
  0x7c   : > { %1029 = vmatpush1.bf16.msra.mxu0 %v2018_v46  ;;  %v1283_v46 = vand.u32 127, %v420_v16 }
  0x7d   : > { %1030 = vmatprep.subr.bf16.mxu0 %v2026_v47  ;;  %1775 = vmatpush3.bf16.msra.mxu1 %v2067_v5  ;;  %v1289_v47 = vadd.s32 %v1288_v45, %v421_v17 }
  0x7e   : > { %1776 = vmatprep.subr.bf16.mxu1 %v2068_v6  ;;  %vm1291_vm1 = vcmp.lt.s32.totalorder %v1283_v46, 10  ;;  %vm1320_vm6 = vcmp.lt.s32.totalorder %v1283_v46, 16 }
  0x7f   : > { %vm1292_vm2 = vcmp.lt.s32.totalorder %v1289_v47, 40 }
  0x80   : > { %1031 = vmatpush1.bf16.msra.mxu0 %v2024_v48  ;;  %v1286_v48 = vadd.s32 8, %v421_v17  ;;  %vm1294_vm3 = vmand %vm1291_vm1, %vm1292_vm2 }
  0x81   : > { %1032 = vmatprep.subr.bf16.mxu0 %v2032_v49  ;;  %1777 = vmatpush3.bf16.msra.mxu1 %v2069_v7 }
  0x84   : > { %1033 = vmatpush1.bf16.msra.mxu0 %v2030_v50  ;;  %v1290_v50 = vadd.s32 %v1288_v45, %v1286_v48 }
  0x85   : > { %1034 = vmatprep.subr.bf16.mxu0 %v2038_v51 }
  0x86   : > { %vm1293_vm4 = vcmp.lt.s32.totalorder %v1290_v50, 40 }
  0x87   : > { %vm1295_vm5 = vmand %vm1291_vm1, %vm1293_vm4 }
  0x88   : > { %1035 = vmatpush1.bf16.msra.mxu0 %v2036_v52  ;;  %v1712_v52 = vld [vmem:[%s2784_s4] ss:$0 sm:$0xff] }
  0x89   : > { %1036 = vmatprep.subr.bf16.mxu0 %v2044_v53 }
  0x8c   : > { %1037 = vmatpush1.bf16.msra.mxu0 %v2042_v54 }
  0x8d   : > { %1038 = vmatprep.subr.bf16.mxu0 %v2047_v55 }
  0x90   : > { %1039 = vmatpush1.bf16.msra.mxu0 %v2045_v56 }
  0x91   : > { %1040 = vmatprep.subr.bf16.mxu0 %v2053_v57 }
  0x94   : > { %1041 = vmatpush1.bf16.msra.mxu0 %v2051_v58 }
  0x97   : > { %1043 = vmatmul.mubr.bf16.vlgmr.msra.gmra.mrb[0].mxu0 %v317_v61 }
 0x12f   : > { %v958_v8 = vpop.f32.mrb[0].mxu1 }
 0x130   : > { %v960_v9 = vpop.f32.mrb[1].mxu1  ;;  %v959_v23 = vadd.f32 %v958_v8, %v423_v21 }
 0x131   : > { %v962_v10 = vpop.f32.mrb[2].mxu1  ;;  %v961_v24 = vadd.f32 %v960_v9, %v427_v22 }
 0x132   : > { %v964_v11 = vpop.f32.mrb[3].mxu1  ;;  %v963_v26 = vadd.f32 %v962_v10, %v423_v21 }
 0x133   : > { %v965_v29 = vadd.f32 %v964_v11, %v427_v22 }
 0x137   : > { %v1087_v12 = vpop.f32.mrb[4].mxu1 }
 0x138   : > { %v1089_v13 = vpop.f32.mrb[5].mxu1 }
 0x139   : > { %v1091_v14 = vpop.f32.mrb[6].mxu1 }
 0x13a   : > { %v1093_v15 = vpop.f32.mrb[7].mxu1 }
 0x16a   : > { %v1044_v25 = vpop.f32.mrb[0].mxu0 }
 0x16b   : > { %v1785_v27 = vadd.f32 %v1044_v25, %v959_v23  ;;  %v1046_v28 = vpop.f32.mrb[1].mxu0 }
 0x16c   : > { %v1788_v30 = vadd.f32 %v1046_v28, %v961_v24  ;;  %v1048_v31 = vpop.f32.mrb[2].mxu0 }
 0x16d   : > { %v1786_v32 = vadd.f32 %v1785_v27, %v1087_v12  ;;  %v1791_v33 = vadd.f32 %v1048_v31, %v963_v26  ;;  %v1050_v34 = vpop.f32.mrb[3].mxu0 }
 0x16e   : > { %v1789_v35 = vadd.f32 %v1788_v30, %v1089_v13  ;;  %v1794_v36 = vadd.f32 %v1050_v34, %v965_v29 }
 0x16f   : > { %1096 = vst [vmem:[%s2667_s29] sm:$0xff] %v1786_v32  ;;  %v1792_v37 = vadd.f32 %v1791_v33, %v1091_v14  ;;  %v1100_v39 = vmax.f32 %v1786_v32, 0.0 }
 0x170   : > { %1097 = vst [vmem:[%s2667_s29 + $0x8] sm:$0xff] %v1789_v35  ;;  %v1795_v38 = vadd.f32 %v1794_v36, %v1093_v15  ;;  %v1101_v41 = vmax.f32 %v1789_v35, 0.0 }
 0x171   : > { %1098 = vst [vmem:[%s2667_s29 + $0x10] sm:$0xff] %v1792_v37  ;;  %v1102_v40 = vmax.f32 %v1792_v37, 0.0 }
 0x172   : > { %1099 = vst [vmem:[%s2667_s29 + $0x18] sm:$0xff] %v1795_v38  ;;  %v1103_v42 = vmax.f32 %v1795_v38, 0.0 }
 0x173   : > { %v1104_v43 = vpack.c.bf16 %v1102_v40, %v1100_v39 }
 0x174   : > { %v1105_v44 = vpack.c.bf16 %v1103_v42, %v1101_v41 }
 0x176   : > { %1273 = vmatprep.mubr.bf16.mxu1 %v1105_v44 }
 0x177   : > { %1274 = vmatmul.mubr.bf16.vlgmr.msra.gmra.mrb[8].mxu1 %v1104_v43 }
 0x24a   : > { %v1778_v49 = vpop.f32.mrb[8].mxu1 }
 0x24b   : > { %v1779_v51 = vpop.f32.mrb[9].mxu1 }
 0x24c   : > { %v1780_v53 = vadd.f32 %v1779_v51, %v1778_v49  ;;  %v1781_v54 = vpop.f32.mrb[10].mxu1 }
 0x24d   : > { %v1782_v55 = vpop.f32.mrb[11].mxu1 }
 0x24e   : > { %v1783_v56 = vadd.f32 %v1782_v55, %v1781_v54  ;;  %v1276_v57 = vadd.f32 %v1780_v53, %v1712_v52 }
 0x250   : > { %v1296_v58 = vsel %vm1294_vm3, %v1276_v57, -1e+30  ;;  %v1279_v59 = vadd.f32 %v1783_v56, %v1712_v52 }
 0x251   : > { %1298 = vmax.xlane.f32.xlu0 %v1296_v58 }
 0x252   : > { %v1297_v60 = vsel %vm1295_vm5, %v1279_v59, -1e+30 }
 0x255   : > { %1300 = vmax.xlane.f32.xlu0 %v1297_v60 }
 0x2de   : > { %v1299_v61 = vpop.xlane.xlu0 %1298 }
 0x2df   : > { %v1302_v62 = vsub.f32 %v1296_v58, %v1299_v61 }
 0x2e1   : > { %v1304_v63 = vmul.f32 1.442695, %v1302_v62 }
 0x2e2   : > { %v1301_v0 = vpop.xlane.xlu0 %1300 }
 0x2e3   : > { %2070 = vpow2.f32 %v1304_v63  ;;  %v1303_v1 = vsub.f32 %v1297_v60, %v1301_v0 }
 0x2e5   : > { %v1306_v2 = vmul.f32 1.442695, %v1303_v1 }
 0x2e7   : > { %2072 = vpow2.f32 %v1306_v2 }
 0x2ed   : > { %v2071_v3 = vpop.eup %2070 }
 0x2ee   : > { %1308 = vadd.xlane.f32.xlu1 %v2071_v3 }
 0x2f1   : > { %v2073_v4 = vpop.eup %2072 }
 0x2f2   : > { %1310 = vadd.xlane.f32.xlu1 %v2073_v4 }
 0x37b   : > { %v1309_v5 = vpop.xlane.xlu1 %1308 }
 0x37c   : > { %2074 = vrcp.f32 %v1309_v5 }
 0x37f   : > { %v1311_v6 = vpop.xlane.xlu1 %1310 }
 0x380   : > { %2076 = vrcp.f32 %v1311_v6 }
 0x386   : > { %v2075_v7 = vpop.eup %2074 }
 0x387   : > { %v1314_v8 = vmul.f32 %v2075_v7, %v2071_v3 }
 0x389   : > { %1316 = vrot.lane.b32.xlu0 %v1314_v8, %s2207_s20 }
 0x38a   : > { %v2077_v9 = vpop.eup %2076 }
 0x38b   : > { %v1315_v10 = vmul.f32 %v2077_v9, %v2073_v4 }
 0x38d   : > { %1318 = vrot.lane.b32.xlu1 %v1315_v10, %s2207_s20 }
 0x3fb   : > { %v1317_v11 = vpop.permute.xlu0 %1316  ;;  %1336 = sbr.rel (!%p2284_p5) target bundleno = 1075 (0x433), region = 44 }
 0x3fc   : > { %v1321_v12 = vsel %vm1320_vm6, %v1276_v57, %v1317_v11 }
 0x3fd   : > { %1323 = vst [vmem:[%s2682_s15] sm:$0xff] %v1321_v12 }
 0x3ff   : > { %v1319_v13 = vpop.permute.xlu1 %1318 }
 0x400   : > { %v1322_v14 = vsel %vm1320_vm6, %v1279_v59, %v1319_v13 }
 0x401   : > { %1324 = vst [vmem:[%s2682_s15 + $0x8] sm:$0xff] %v1322_v14 }
 0x402   : > { %s2800_s16 = smov (!%p1339_p11, %s1338_s16), 2 }
 0x403   : > { %s1733_s28 = sshll.u32 %s2800_s16, 7 }
 0x404   : > { %p1736_p12 = scmp.eq.s32.totalorder %s1733_s28, 0 }
 0x405   : > { %s2701_s10 = sshrl.u32 (!%p1736_p12), %s2800_s16, 1 }
 0x406   : > { %1347 = sbr.rel (%p1736_p12) target bundleno = 1075 (0x433), region = 48  ;;  %p1737_p13 = scmp.le.s32.totalorder (!%p1736_p12), %s2701_s10, 0 }
 0x40d   : > { %1552 = sbr.rel (%p1737_p13) target bundleno = 1054 (0x41e), region = 141  ;;  %s2174_s11 = smov (!%p1737_p13), %s2695_s18  }
 0x40e   : > { %s2178_s20 = smov (!%p1737_p13), %s2682_s15   ;;  %s2182_s14 = smov (!%p1737_p13), 0  }
 0x40f   : > { %s2186_s9 = smov (!%p1737_p13), 0  }
 0x414 LB: >> { %v1411_v15 = vld [vmem:[%s2180_s20] sm:$0xff]  ;;  %v1413_v16 = vld [vmem:[%s2180_s20 + $0x8] sm:$0xff]  ;;  %s1415_s19 = sadd.s32 1, %s2184_s14  ;;  %s1405_s9 = sadd.s32 1, %s2188_s9   ;;  %s2188_s9 = sphi %s2186_s9, %s1405_s9   ;;  %s2184_s14 = sphi %s2182_s14, %s2183_s14   ;;  %s2180_s20 = sphi %s2178_s20, %s1420_s20   ;;  %s2176_s11 = sphi %s2174_s11, %s1421_s11  }
 0x415   : >> { %1412 = vst [vmem:[%s2176_s11] sm:$0xff] %v1411_v15  ;;  %1414 = vst [vmem:[%s2176_s11 + $0x8] sm:$0xff] %v1413_v16  ;;  %p1416_p0 = scmp.ge.s32.totalorder %s1415_s19, %s2701_s10  ;;  %p1404_p1 = scmp.ge.s32.totalorder %s1405_s9, %s2701_s10 }
 0x417   : >> { %s2802_s19 = smov (%p1416_p0, %s1415_s19), 0  ;;  %1407 = sbr.rel (!%p1404_p1) target bundleno = 1044 (0x414), region = 147 }
 0x418   : >> { %s1738_s17 = sshll.u32 %s2802_s19, 4  ;;  %s2183_s14 = smov %s2802_s19  }
 0x419   : >> { %s1420_s20 = scalar_lea.vmem %s2682_s15, %s1738_s17 [#allocation2]   ;;  %s1421_s11 = scalar_lea.vmem %s2695_s18, %s1738_s17  }
 0x41e PF: > { %s2711_s28 = sand.u32 1, %s2800_s16   ;;  %s1757_s14 = sshll.u32 %s2701_s10, 4 }
 0x41f   : > { %s1426_s13 = scalar_lea.vmem %s2682_s15, %s1757_s14 [#allocation2]   ;;  %s1428_s0 = scalar_lea.vmem %s2695_s18, %s1757_s14  }
 0x420   : > { %p1743_p2 = scmp.le.s32.totalorder %s2711_s28, 0 }
 0x421   : > { %s2190_s17 = smov (!%p1743_p2), %s1428_s0   ;;  %s2194_s1 = smov (!%p1743_p2), %s1426_s13  }
 0x422   : > { %1566 = sbr.rel (%p1743_p2) target bundleno = 1075 (0x433), region = 152  ;;  %s2198_s11 = smov (!%p1743_p2), 0  }
 0x423   : > { %s2202_s20 = smov (!%p1743_p2), 0  }
 0x429 LB: >> { %v1438_v17 = vld [vmem:[%s2196_s1] sm:$0xff]  ;;  %s1440_s16 = sadd.s32 1, %s2200_s11  ;;  %s1432_s20 = sadd.s32 1, %s2204_s20   ;;  %s2204_s20 = sphi %s2202_s20, %s1432_s20   ;;  %s2200_s11 = sphi %s2198_s11, %s2199_s11   ;;  %s2196_s1 = sphi %s2194_s1, %s1445_s1   ;;  %s2192_s17 = sphi %s2190_s17, %s1446_s17  }
 0x42a   : >> { %1439 = vst [vmem:[%s2192_s17] sm:$0xff] %v1438_v17  ;;  %p1441_p3 = scmp.ge.s32.totalorder %s1440_s16, %s2711_s28  ;;  %p1431_p4 = scmp.ge.s32.totalorder %s1432_s20, %s2711_s28 }
 0x42c   : >> { %s2804_s16 = smov (%p1441_p3, %s1440_s16), 0  ;;  %1434 = sbr.rel (!%p1431_p4) target bundleno = 1065 (0x429), region = 158 }
 0x42d   : >> { %s1744_s15 = sshll.u32 %s2804_s16, 3  ;;  %s2199_s11 = smov %s2804_s16  }
 0x42e   : >> { %s1445_s1 = scalar_lea.vmem %s1426_s13, %s1744_s15 [#allocation2]   ;;  %s1446_s17 = scalar_lea.vmem %s1428_s0, %s1744_s15  }
 0x433 PF: > { %1452 = sbr.rel (!%p2284_p5) target bundleno = 1111 (0x457), region = 96  ;;  %s1454_s18 = ssub.s32 (%p2284_p5), 5, %s2313_s26 }
 0x434   : > { %p1455_p7 = scmp.lt.s32.totalorder (%p2284_p5), %s1454_s18, 2  ;;  %s2793_s19 = scalar_lea.sflag (%p2284_p5), [#allocation4], %s2652_s12 }
 0x43a   : > { %s2806_s18 = smov (!%p1455_p7, %s1454_s18), 2 }
 0x43b   : > { %s2722_s10 = sshll.u32 %s2806_s18, 8 }
 0x43c   : > { %s1460_s9 = ssub.s32 512, %s2722_s10 }
 0x43d   : > { %1461 = vsyncadd %s2793_s19, %s1460_s9  ;;  %p1749_p8 = scmp.ne.s32.totalorder %s2722_s10, 0  ;;  %s1761_s0 = sshll.u32 %s2267_s25, 9 }
 0x43e   : > { %s2732_s13 = scalar_lea.hbm %s2786_s6, %s1761_s0  ;;  %s1467_s26 = sshll.u32 %s2667_s29, 4  ;;  %s2735_s26 = int_to_ptr.vmem [resolvable:$true] %s1467_s26 }
 0x43f   : > { %s2078_s28 = scalar_lea.vmem %s2735_s26, %s2722_s10  ;;  %s2208_s14 = smov [#allocation3]  }
 0x440   : > { %p2079_p5 = scmp.ne.s32.totalorder %s2735_s26, %s2078_s28  ;;  %s2082_s17 = sshll.u32 %s2208_s14, 4  ;;  %s2083_s17 = int_to_ptr.vmem [resolvable:$false] %s2082_s17 }
 0x441   : > { %s2084_s25 = scalar_lea.vmem %s2083_s17, 1024  ;;  %p2085_p11 = scmp.lt.s32.totalorder %s2735_s26, %s2083_s17 }
 0x442   : > { %p2080_p9 = pnand %p2079_p5, %p1749_p8  ;;  %p2086_p12 = scmp.lt.s32.totalorder %s2084_s25, %s2078_s28 }
 0x444   : > { %p2081_p10 = pneg %p2080_p9  ;;  %p2087_p13 = por %p2086_p12, %p2085_p11 }
 0x446   : > { %p2088_p0 = pnand %p2087_p13, %p2081_p10 }
 0x448   : > { %2091 = shalt.err (!%p2088_p0)
}
 0x449   : > { %s2092_s29 = scalar_lea.hbm %s2732_s13, %s2722_s10  ;;  %s2096_s16 = scalar_lea.hbm %s2786_s6, 1280 }
 0x44a   : > { %p2093_p1 = scmp.ne.s32.totalorder %s2732_s13, %s2092_s29  ;;  %p2097_p4 = scmp.lt.u32.totalorder %s2732_s13, %s2786_s6 }
 0x44b   : > { %p2098_p7 = scmp.lt.u32.totalorder %s2096_s16, %s2092_s29  ;;  %p2100_p9 = scmp.lt.u32.totalorder %s2092_s29, %s2732_s13 }
 0x44c   : > { %p2094_p2 = pnand %p2093_p1, %p1749_p8 }
 0x44d   : > { %p2099_p5 = por %p2098_p7, %p2097_p4 }
 0x44e   : > { %p2095_p3 = pneg %p2094_p2 }
 0x44f   : > { %p2101_p10 = por %p2100_p9, %p2099_p5 }
 0x451   : > { %p2102_p11 = pnand %p2101_p10, %p2095_p3 }
 0x453   : > { %2105 = shalt.err (!%p2102_p11)
}
 0x454   : > { %s2209_s9 = smov 256   ;;  %s2210_s19 = smov 16  }
 0x455   : > { %s2794_s0 = scalar_lea.sflag [#allocation4], %s2652_s12 }
 0x456   : > { %1473 = dma.vmem_to_hbm [thread:$0]  (%p1749_p8), %s2735_s26, %s2722_s10, %s2732_s13, %s2794_s0, %s2209_s9, %s2209_s9, %s2210_s19  }
 0x457 PF: > { %p1806_p12 = scmp.ge.s32.totalorder %s2172_s24, 2  ;;  %s1489_s1 = sand.u32 1, %s2160_s21  }
 0x458   : > { %s1490_s7 = scalar_lea.sflag [#allocation4], %s1489_s1 }
 0x459   : > { %p1803_p13 = pnand %p1806_p12, %p2288_p6 }
 0x45b   : > { %2155 = dma.done.wait (!%p1803_p13), %s1490_s7, 512  }
 0x45c   : > { %2157 = vsyncadd (!%p1803_p13), %s1490_s7, 4294966784  ;;  %p17_p0 = scmp.ge.s32.totalorder %s2271_s27, 5   ;;  %s2795_s21 = smov %s2164_s22 }
 0x45d   : > { %s2796_s22 = smov %s2168_s23  ;;  %s2797_s23 = smov %s2282_s30 }
 0x45e   : > { %s2798_s24 = smov %s2271_s27  ;;  %19 = sbr.rel (!%p17_p0) target bundleno = 6 (0x6), region = 169 }
 0x465   :  { %1495 = vsyncpa [#allocation4], 1 }
 0x466   :  { %1497 = vsyncpa [#allocation4 + $0x1], 1 }

</bundles_post_ra>
